<compile_context>
chip_gen: v6e
topology: v6e:2x2x1
jax: 0.10.0
libtpu: 0.0.40
codegen_flags: <defaults>
</compile_context>

<pallas_src>
import functools
import math

import jax
import jax.numpy as jnp
from jax import lax
from jax.experimental import pallas as pl
from jax.experimental.pallas import tpu as pltpu


def _round_up(v, mult):
    return (v + mult - 1) // mult * mult


def _adacos_logits_kernel(x_ref, wt_ref, wsq_ref, xsq_ref, label_ref, s_ref,
                          logits_ref, bsum_ref, *, ls_eps, num_classes, tile_c):
    """One (TB, TC) tile: cosine logits + partial B_avg accumulation."""
    j = pl.program_id(1)  # class-tile index (accumulated / "arbitrary" axis)

    # MXU: raw inner products, f32 accumulation (operands may be bf16).
    raw = lax.dot_general(
        x_ref[...], wt_ref[...],
        dimension_numbers=(((1,), (0,)), ((), ())),
        preferred_element_type=jnp.float32)                      # [TB, TC]

    # Post-matmul normalization.  Squared norms are precomputed in f32 in XLA
    # (not recomputed per tile); rsqrt goes to the EUP (free VLIW slot).
    # F.normalize eps: v / max(||v||, 1e-12)  ->  rsqrt(max(sumsq, 1e-24)).
    x_inv = lax.rsqrt(jnp.maximum(xsq_ref[...], 1e-24))          # [TB, 1]
    w_inv = lax.rsqrt(jnp.maximum(wsq_ref[...], 1e-24))          # [1, TC]

    logits = raw * x_inv * w_inv                                  # cos(theta)
    logits_ref[...] = logits

    # ---- partial B_avg: sum(exp(s_prev * logits)) over valid columns ----
    s_prev = s_ref[0, 0]                                          # runtime scalar (SMEM)
    cls = tile_c * j + lax.broadcasted_iota(jnp.int32, logits.shape, 1)
    valid = cls < num_classes                                     # mask class padding
    if ls_eps <= 0:
        # torch: one_hot < 1 excludes exactly the target entries when ls_eps==0.
        valid = jnp.logical_and(valid, cls != label_ref[...])
    # (ls_eps > 0 -> smoothed one_hot < 1 everywhere -> nothing excluded.)
    contrib = jnp.where(valid, jnp.exp(s_prev * logits), 0.0)

    @pl.when(j == 0)
    def _init():
        bsum_ref[...] = jnp.zeros_like(bsum_ref)

    bsum_ref[...] += jnp.sum(contrib, axis=1, keepdims=True)      # [TB, 1]


def adacos_forward(x, label, weight, s_prev=None, *, m=0.5, ls_eps=0.0,
                   theta_zero=math.pi / 4, tile_b=256, tile_c=1024,
                   use_bf16=True, interpret=False):
    """AdaCos forward.  Returns (output, s_new); carry s_new as the next s_prev."""
    x = jnp.asarray(x, jnp.float32)
    weight = jnp.asarray(weight, jnp.float32)
    B, D = x.shape
    C, D2 = weight.shape
    assert D == D2

    if s_prev is None:
        s_prev = math.log(C - 1) / math.cos(theta_zero)
    s_prev_arr = jnp.asarray(s_prev, jnp.float32).reshape(1, 1)

    # Lane-dense tiles: TC multiple of 128, TB multiple of 8 (f32 output tile).
    TB = min(tile_b, _round_up(B, 8))
    TC = min(tile_c, _round_up(C, 128))
    B_pad = _round_up(B, TB)
    C_pad = _round_up(C, TC)

    cdt = jnp.bfloat16 if use_bf16 else jnp.float32
    x_p = jnp.pad(x.astype(cdt), ((0, B_pad - B), (0, 0)))
    w_t = jnp.pad(weight.T.astype(cdt), ((0, 0), (0, C_pad - C)))       # [D, C_pad]
    w_sq = jnp.pad(jnp.sum(weight * weight, axis=1).reshape(1, C),      # [1, C_pad]
                   ((0, 0), (0, C_pad - C)))
    x_sq = jnp.pad(jnp.sum(x * x, axis=1).reshape(B, 1),                # [B_pad, 1]
                   ((0, B_pad - B), (0, 0)))
    lbl = jnp.pad(label.astype(jnp.int32).reshape(B, 1),
                  ((0, B_pad - B), (0, 0)), constant_values=-1)

    grid = (B_pad // TB, C_pad // TC)
    kernel = functools.partial(_adacos_logits_kernel, ls_eps=ls_eps,
                               num_classes=C, tile_c=TC)

    logits_pad, bsum_rows = pl.pallas_call(
        kernel,
        grid=grid,
        in_specs=[
            pl.BlockSpec((TB, D), lambda i, j: (i, 0)),          # x tile (bf16)
            pl.BlockSpec((D, TC), lambda i, j: (0, j)),          # W^T tile (no XLU transpose)
            pl.BlockSpec((1, TC), lambda i, j: (0, j)),          # per-class ||w||^2 (f32)
            pl.BlockSpec((TB, 1), lambda i, j: (i, 0)),          # per-row ||x||^2 (f32)
            pl.BlockSpec((TB, 1), lambda i, j: (i, 0)),          # labels
            pl.BlockSpec(memory_space=pltpu.MemorySpace.SMEM),   # previous running s
        ],
        out_specs=(
            pl.BlockSpec((TB, TC), lambda i, j: (i, j)),         # raw cosine logits
            pl.BlockSpec((TB, 1), lambda i, j: (i, 0)),          # resident bsum accumulator
        ),
        out_shape=(
            jax.ShapeDtypeStruct((B_pad, C_pad), jnp.float32),
            jax.ShapeDtypeStruct((B_pad, 1), jnp.float32),
        ),
        compiler_params=pltpu.CompilerParams(
            dimension_semantics=("parallel", "arbitrary"),
            vmem_limit_bytes=32 * 1024 * 1024),
        interpret=interpret,
    )(x_p, w_t, w_sq, x_sq, lbl, s_prev_arr)

    logits = logits_pad[:B, :C]
    b_avg = jnp.sum(bsum_rows[:B, 0]) / B

    # --- dynamic scale update (torch.no_grad block) in XLA glue -------------
    clamped = jnp.clip(logits, -1.0 + 1e-7, 1.0 - 1e-7)
    # torch.median returns the lower of the two medians for even n; acos is
    # monotone decreasing, so lower-median(theta) = acos(k-th largest clamped
    # logit) with k = ceil(n/2).  Selection via top_k, not a full sort.
    n = B * C
    k = n - n // 2
    kth_largest = lax.top_k(clamped.reshape(-1), k)[0][k - 1]
    theta_med = jnp.arccos(kth_largest)
    s_new = jnp.log(b_avg) / jnp.cos(jnp.minimum(theta_zero, theta_med))

    # --- margin mix + final scaling, fused by XLA with the logits readback --
    sin_theta = jnp.sqrt(1.0 - clamped * clamped)
    target_logits = clamped * math.cos(m) - sin_theta * math.sin(m)  # cos(theta+m)
    one_hot = (label.astype(jnp.int32)[:, None]
               == jnp.arange(C, dtype=jnp.int32)[None, :]).astype(jnp.float32)
    if ls_eps > 0:
        one_hot = (1.0 - ls_eps) * one_hot + ls_eps / C
    output = (logits * (1.0 - one_hot) + target_logits * one_hot) * s_new
    return output, s_new


def adacos_reference(x, label, weight, s_prev, *, m=0.5, ls_eps=0.0,
                     theta_zero=math.pi / 4):
    """Pure-JAX mirror of the PyTorch module (for verification)."""
    eps = 1e-12
    xn = x / jnp.maximum(jnp.linalg.norm(x, axis=1, keepdims=True), eps)
    wn = weight / jnp.maximum(jnp.linalg.norm(weight, axis=1, keepdims=True), eps)
    logits = xn @ wn.T
    theta = jnp.arccos(jnp.clip(logits, -1.0 + 1e-7, 1.0 - 1e-7))
    target_logits = jnp.cos(theta + m)
    C = weight.shape[0]
    one_hot = (label[:, None] == jnp.arange(C)[None, :]).astype(jnp.float32)
    if ls_eps > 0:
        one_hot = (1.0 - ls_eps) * one_hot + ls_eps / C
    output = logits * (1.0 - one_hot) + target_logits * one_hot
    b_avg = jnp.sum(jnp.where(one_hot < 1.0, jnp.exp(s_prev * logits), 0.0)) / x.shape[0]
    n = theta.size
    theta_med = jnp.sort(theta.reshape(-1))[(n - 1) // 2]   # torch lower median
    s_new = jnp.log(b_avg) / jnp.cos(jnp.minimum(theta_zero, theta_med))
    return output * s_new, s_new


if __name__ == "__main__":
    # Small shapes consistent with the module: batch=8, in_features=32, classes=16.
    B, D, C = 8, 32, 16
    key = jax.random.PRNGKey(0)
    kx, kw, kl = jax.random.split(key, 3)

    x = jax.random.normal(kx, (B, D), dtype=jnp.float32)
    bound = math.sqrt(6.0 / (D + C))                       # xavier_uniform_
    weight = jax.random.uniform(kw, (C, D), jnp.float32, -bound, bound)
    label = jax.random.randint(kl, (B,), 0, C, dtype=jnp.int32)
    s0 = jnp.float32(math.log(C - 1) / math.cos(math.pi / 4))  # initial running s

    fwd = jax.jit(functools.partial(adacos_forward, m=0.5, ls_eps=0.0))
    output, s_new = fwd(x, label, weight, s0)
    jax.block_until_ready((output, s_new))

    out_ref, s_ref = adacos_reference(x, label, weight, s0, m=0.5, ls_eps=0.0)

    assert output.shape == (B, C) and output.dtype == jnp.float32
    assert bool(jnp.all(jnp.isfinite(output)))
    err = float(jnp.max(jnp.abs(output - out_ref)))
    err_s = float(jnp.abs(s_new - s_ref))
    # Loose tolerances: bf16 MXU operands (f32 accumulation) by default.
    assert err < 0.2, f"output mismatch vs reference: max abs err = {err}"
    assert err_s < 0.1, f"s mismatch vs reference: abs err = {err_s}"
    print("KERNEL_OK")
</pallas_src>

<mosaic_0001>
module attributes {stable_mosaic.version = 11 : i64} {
  func.func @_adacos_logits_kernel(%arg0: i32, %arg1: i32, %arg2: memref<8x32xbf16, #tpu.memory_space<vmem>>, %arg3: memref<32x128xbf16, #tpu.memory_space<vmem>>, %arg4: memref<1x128xf32, #tpu.memory_space<vmem>>, %arg5: memref<8x1xf32, #tpu.memory_space<vmem>>, %arg6: memref<8x1xi32, #tpu.memory_space<vmem>>, %arg7: memref<1x1xf32, #tpu.memory_space<smem>>, %arg8: memref<8x128xf32, #tpu.memory_space<vmem>>, %arg9: memref<8x1xf32, #tpu.memory_space<vmem>>) attributes {dimension_semantics = [#tpu.dimension_semantics<parallel>, #tpu.dimension_semantics<arbitrary>], iteration_bounds = array<i64: 1, 1>, scalar_prefetch = 0 : i64, scratch_operands = 0 : i64, tpu.core_type = #tpu.core_type<tc>, window_params = [{transform_indices = @transform_0, window_bounds = array<i64: 8, 32>}, {transform_indices = @transform_1, window_bounds = array<i64: 32, 128>}, {transform_indices = @transform_2, window_bounds = array<i64: 1, 128>}, {transform_indices = @transform_3, window_bounds = array<i64: 8, 1>}, {transform_indices = @transform_4, window_bounds = array<i64: 8, 1>}, {transform_indices = @transform_5, window_bounds = array<i64: 1, 1>}, {transform_indices = @transform_6, window_bounds = array<i64: 8, 128>}, {transform_indices = @transform_7, window_bounds = array<i64: 8, 1>}]} {
    %c0 = arith.constant 0 : index
    %c0_0 = arith.constant 0 : index
    %0 = vector.load %arg2[%c0, %c0_0] : memref<8x32xbf16, #tpu.memory_space<vmem>>, vector<8x32xbf16>
    %c0_1 = arith.constant 0 : index
    %c0_2 = arith.constant 0 : index
    %1 = vector.load %arg3[%c0_1, %c0_2] : memref<32x128xbf16, #tpu.memory_space<vmem>>, vector<32x128xbf16>
    %cst = arith.constant dense<0.000000e+00> : vector<8x128xf32>
    %2 = tpu.matmul %0, %1, %cst {dimension_numbers = #tpu.dot_dimension_numbers<[1], [0], [0], [1], [0, 0, 1, 1], [], []>} : vector<8x32xbf16>, vector<32x128xbf16>, vector<8x128xf32> -> vector<8x128xf32>
    %c0_3 = arith.constant 0 : index
    %c0_4 = arith.constant 0 : index
    %3 = vector.load %arg5[%c0_3, %c0_4] : memref<8x1xf32, #tpu.memory_space<vmem>>, vector<8x1xf32>
    %cst_5 = arith.constant 1.000000e-24 : f32
    %4 = vector.broadcast %cst_5 : f32 to vector<8x1xf32>
    %5 = arith.maximumf %3, %4 : vector<8x1xf32>
    %6 = math.rsqrt %5 : vector<8x1xf32>
    %c0_6 = arith.constant 0 : index
    %c0_7 = arith.constant 0 : index
    %7 = vector.load %arg4[%c0_6, %c0_7] : memref<1x128xf32, #tpu.memory_space<vmem>>, vector<1x128xf32>
    %cst_8 = arith.constant 1.000000e-24 : f32
    %8 = vector.broadcast %cst_8 : f32 to vector<1x128xf32>
    %9 = arith.maximumf %7, %8 : vector<1x128xf32>
    %10 = math.rsqrt %9 : vector<1x128xf32>
    %11 = vector.broadcast %6 : vector<8x1xf32> to vector<8x128xf32>
    %12 = arith.mulf %2, %11 : vector<8x128xf32>
    %13 = vector.broadcast %10 : vector<1x128xf32> to vector<8x128xf32>
    %14 = arith.mulf %12, %13 : vector<8x128xf32>
    %c0_9 = arith.constant 0 : index
    %c0_10 = arith.constant 0 : index
    %15 = vector.load %arg8[%c0_9, %c0_10] : memref<8x128xf32, #tpu.memory_space<vmem>>, vector<8x128xf32>
    tpu.vector_store %arg8[%c0_9, %c0_10], %14 {strides = array<i32>} : memref<8x128xf32, #tpu.memory_space<vmem>>, vector<8x128xf32>,
    %c0_11 = arith.constant 0 : index
    %c0_12 = arith.constant 0 : index
    %16 = memref.load %arg7[%c0_11, %c0_12] : memref<1x1xf32, #tpu.memory_space<smem>>
    %c128_i32 = arith.constant 128 : i32
    %17 = arith.muli %c128_i32, %arg1 : i32
    %18 = tpu.iota {dimensions = array<i32: 1>} : vector<8x128xi32>
    %19 = vector.broadcast %17 : i32 to vector<8x128xi32>
    %20 = arith.addi %19, %18 : vector<8x128xi32>
    %c16_i32 = arith.constant 16 : i32
    %21 = vector.broadcast %c16_i32 : i32 to vector<8x128xi32>
    %22 = arith.cmpi slt, %20, %21 : vector<8x128xi32>
    %c0_13 = arith.constant 0 : index
    %c0_14 = arith.constant 0 : index
    %23 = vector.load %arg6[%c0_13, %c0_14] : memref<8x1xi32, #tpu.memory_space<vmem>>, vector<8x1xi32>
    %24 = vector.broadcast %23 : vector<8x1xi32> to vector<8x128xi32>
    %25 = arith.cmpi ne, %20, %24 : vector<8x128xi32>
    %26 = arith.andi %22, %25 : vector<8x128xi1>
    %27 = vector.broadcast %16 : f32 to vector<8x128xf32>
    %28 = arith.mulf %27, %14 : vector<8x128xf32>
    %29 = math.exp %28 : vector<8x128xf32>
    %cst_15 = arith.constant 0.000000e+00 : f32
    %30 = vector.broadcast %cst_15 : f32 to vector<8x128xf32>
    %31 = arith.select %26, %29, %30 : vector<8x128xi1>, vector<8x128xf32>
    %c0_i32 = arith.constant 0 : i32
    %32 = arith.cmpi eq, %arg1, %c0_i32 : i32
    %33 = arith.extui %32 : i1 to i32
    %c0_i32_16 = arith.constant 0 : i32
    %34 = arith.cmpi ne, %33, %c0_i32_16 : i32
    scf.if %34 {
      %cst_22 = arith.constant 0.000000e+00 : f32
      %40 = vector.broadcast %cst_22 : f32 to vector<8x1xf32>
      %c0_23 = arith.constant 0 : index
      %c0_24 = arith.constant 0 : index
      %41 = vector.load %arg9[%c0_23, %c0_24] : memref<8x1xf32, #tpu.memory_space<vmem>>, vector<8x1xf32>
      tpu.vector_store %arg9[%c0_23, %c0_24], %40 {strides = array<i32>} : memref<8x1xf32, #tpu.memory_space<vmem>>, vector<8x1xf32>,
    } else {
    }
    %c0_17 = arith.constant 0 : index
    %c0_18 = arith.constant 0 : index
    %35 = vector.load %arg9[%c0_17, %c0_18] : memref<8x1xf32, #tpu.memory_space<vmem>>, vector<8x1xf32>
    %cst_19 = arith.constant dense<0.000000e+00> : vector<8xf32>
    %36 = vector.multi_reduction <add>, %31, %cst_19 [1] : vector<8x128xf32> to vector<8xf32>
    %37 = vector.shape_cast %36 : vector<8xf32> to vector<8x1xf32>
    %38 = arith.addf %35, %37 : vector<8x1xf32>
    %c0_20 = arith.constant 0 : index
    %c0_21 = arith.constant 0 : index
    %39 = vector.load %arg9[%c0_20, %c0_21] : memref<8x1xf32, #tpu.memory_space<vmem>>, vector<8x1xf32>
    tpu.vector_store %arg9[%c0_20, %c0_21], %38 {strides = array<i32>} : memref<8x1xf32, #tpu.memory_space<vmem>>, vector<8x1xf32>,
    return
  }
  func.func @transform_0(%arg0: i32, %arg1: i32) -> (i32, i32) {
    %c0_i32 = arith.constant 0 : i32
    %c0_i32_0 = arith.constant 0 : i32
    return %arg0, %c0_i32 : i32, i32
  }
  func.func @transform_1(%arg0: i32, %arg1: i32) -> (i32, i32) {
    %c0_i32 = arith.constant 0 : i32
    %c0_i32_0 = arith.constant 0 : i32
    return %c0_i32, %arg1 : i32, i32
  }
  func.func @transform_2(%arg0: i32, %arg1: i32) -> (i32, i32) {
    %c0_i32 = arith.constant 0 : i32
    %c0_i32_0 = arith.constant 0 : i32
    return %c0_i32, %arg1 : i32, i32
  }
  func.func @transform_3(%arg0: i32, %arg1: i32) -> (i32, i32) {
    %c0_i32 = arith.constant 0 : i32
    %c0_i32_0 = arith.constant 0 : i32
    return %arg0, %c0_i32 : i32, i32
  }
  func.func @transform_4(%arg0: i32, %arg1: i32) -> (i32, i32) {
    %c0_i32 = arith.constant 0 : i32
    %c0_i32_0 = arith.constant 0 : i32
    return %arg0, %c0_i32 : i32, i32
  }
  func.func @transform_5(%arg0: i32, %arg1: i32) -> (i32, i32) {
    %c0_i32 = arith.constant 0 : i32
    %c0_i32_0 = arith.constant 0 : i32
    %c0_i32_1 = arith.constant 0 : i32
    return %c0_i32, %c0_i32_0 : i32, i32
  }
  func.func @transform_6(%arg0: i32, %arg1: i32) -> (i32, i32) {
    %c0_i32 = arith.constant 0 : i32
    return %arg0, %arg1 : i32, i32
  }
  func.func @transform_7(%arg0: i32, %arg1: i32) -> (i32, i32) {
    %c0_i32 = arith.constant 0 : i32
    %c0_i32_0 = arith.constant 0 : i32
    return %arg0, %c0_i32 : i32, i32
  }
}

</mosaic_0001>

<bundles_post_ra>
// kernel: adacos_forward.1
= control target key start
LH: loop header
LB: loop body
LE: loop exit
PB: predicated region body
PF: predicated region fallthrough
CT: control target
= control target key end

     0   :  { %v172_v0 = vmov 0.0   ;;  %vm173_vm0 = vmmov 0   ;;  %v174_v2 = vmov 0   ;;  %vm44_vm1 = vcmask 261120   ;;  %s250_s1 = inlined_call_operand.vmem [shape: bf16[32,128], index: 1, kind: input, shape index: {}]   ;;  %s251_s3 = inlined_call_operand.vmem [shape: f32[8,1], index: 3, kind: input, shape index: {}]   ;;  %s252_s0 = inlined_call_operand.vmem [shape: bf16[8,32], index: 0, kind: input, shape index: {}]   ;;  %s253_s4 = inlined_call_operand.vmem [shape: s32[8,1], index: 4, kind: input, shape index: {}]   ;;  %s254_s7 = inlined_call_operand.vmem [shape: f32[8,1], index: 7, kind: output, shape index: {1}]   ;;  %s255_s2 = inlined_call_operand.vmem [shape: f32[1,128], index: 2, kind: input, shape index: {}]   ;;  %s256_s5 = inlined_call_operand.<no memory space> [shape: f32[1,1], index: 5, kind: input, shape index: {}]   ;;  %s257_s6 = inlined_call_operand.vmem [shape: f32[8,128], index: 6, kind: output, shape index: {0}]  }
   0x1   :  { %152 = vmatprep.subr.bf16.mxu0 %v172_v0  ;;  %v164_v1 = vld [vmem:[%s250_s1 + $0x8] sm:$0xff]   ;;  %156 = vmatprep.mubr.msk.bf16.mxu0 %vm173_vm0, %v172_v0  ;;  %v165_v3 = vld [vmem:[%s250_s1] sm:$0xff]   ;;  %vm130_vm2 = vcmask 7168   ;;  %v101_v11 = vlaneseq  ;;  %v121_v19 = vstv %s256_s5 }
   0x2   :  { %163 = vset.pattern.permute.xlu0 %v174_v2  ;;  %153 = vmatpush3.bf16.msra.mxu0 %v164_v1  ;;  %v88_v4 = vld [vmem:[%s251_s3] sm:$0xff]  ;;  %131 = vst.msk [vmem:[%s254_s7] sm:$0xff] %vm130_vm2, %v172_v0 }
   0x3   :  { %154 = vmatprep.subr.bf16.mxu0 %v172_v0  ;;  %v89_v5 = vmax.f32 %v88_v4, 1e-24  ;;  %v27_v6 = vld [vmem:[%s252_s0] sm:$0xf]  ;;  %v102_v12 = vshrl.u32 %v101_v11, 7  ;;  %v111_v26 = vand.u32 127, %v101_v11 }
   0x4   :  { %v115_v8 = vld [vmem:[%s253_s4] sm:$0xff] }
   0x5   :  { %166 = vrsqrt.f32 %v89_v5  ;;  %v91_v9 = vld [vmem:[%s255_s2] sm:$0x1]  ;;  %v103_v13 = vsub.s32 0, %v102_v12  ;;  %vm114_vm4 = vcmp.lt.s32.totalorder %v111_v26, 16 }
   0x6   :  { %155 = vmatpush3.bf16.msra.mxu0 %v165_v3  ;;  %v92_v10 = vmax.f32 %v91_v9, 1e-24 }
   0x8   :  { %168 = vrsqrt.f32 %v92_v10 }
   0x9   :  { %157 = vmatmul.mubr.msk.bf16.vlgmr.msra.gmra.mxu0 %vm44_vm1, %v27_v6  ;;  %v132_v30 = vld [vmem:[%s254_s7] sm:$0xff] }
  0x12   :  { %v167_v7 = vpop.eup %166 }
  0x13   :  { %96 = vperm.xlu0 %163, %v167_v7  }
  0x15   :  { %v169_v14 = vpop.eup %168 }
  0x16   :  { %v104_v15 = vrot.slane %v169_v14, %v103_v13 }
  0x17   :  { %117 = vperm.xlu0 %163, %v115_v8  }
  0x8e   :  { %v97_v16 = vpop.permute.xlu0 %96 }
  0x92   :  { %v118_v27 = vpop.permute.xlu0 %117 }
  0x93   :  { %vm119_vm3 = vcmp.ne.s32.totalorder %v111_v26, %v118_v27 }
  0x94   :  { %vm120_vm5 = vmand %vm114_vm4, %vm119_vm3 }
  0xc9   :  { %v82_v17 = vpop.f32.mrf.mxu0 }
  0xca   :  { %v99_v18 = vmul.f32 %v97_v16, %v82_v17 }
  0xcb   :  { %v158_v20 = vpop.f32.mrf.mxu0 }
  0xcc   :  { %v106_v21 = vmul.f32 %v104_v15, %v99_v18 }
  0xcd   :  { %v85_v22 = vpop.f32.mrf.mxu0 }
  0xce   :  { %107 = vst [vmem:[%s257_s6] sm:$0xff] %v106_v21  ;;  %v122_v23 = vmul.f32 %v121_v19, %v106_v21 }
  0xcf   :  { %v159_v24 = vpop.f32.mrf.mxu0 }
  0xd0   :  { %v123_v25 = vmul.f32 1.442695, %v122_v23 }
  0xd2   :  { %170 = vpow2.f32 %v123_v25 }
  0xdf   :  { %v171_v28 = vpop.eup %170 }
  0xe0   :  { %v125_v29 = vsel %vm120_vm5, %v171_v28, 0.0 }
  0xe1   :  { %133 = vadd.xlane.f32.xlu1 %v125_v29 }
 0x16a   :  { %v134_v31 = vpop.xlane.xlu1 %133 }
 0x16b   :  { %v135_v32 = vadd.f32 %v134_v31, %v132_v30 }
 0x16d   :  { %137 = vst.msk [vmem:[%s254_s7] sm:$0xff] %vm130_vm2, %v135_v32 }

</bundles_post_ra>
